<compile_context>
chip_gen: v6e
topology: v6e:2x2x1
jax: 0.10.0
libtpu: 0.0.40
codegen_flags: <defaults>
</compile_context>

<pallas_src>
import jax
import jax.numpy as jnp
from jax.experimental import pallas as pl
from jax.experimental.pallas import tpu as pltpu

INPUT_SIZE = 784
HIDDEN_SIZES = [256, 256, 6, 5, 5, 5]
OUTPUT_SIZE = 10
P_DROP = 0.3

K_PAD = 896          # 784 -> 7*128 : clean lane / MXU-K tiling for fc1
N_PAD = 128          # 10  -> 128   : lane-dense fc2, log-softmax and stores
NEG_BIG = -1e30      # bias for padded logit lanes: never wins max, exp() == 0


def _round_up(n, m):
    return (n + m - 1) // m * m


def ff_kernel(x_ref, mask_ref, w1_ref, b1_ref, w2_ref, b2_ref, o_ref):
    # ---- fc1: (TB, 896) @ (896, 256) on the MXU; bf16 inputs, f32 accum ----
    x = x_ref[...].astype(jnp.bfloat16)
    h = jnp.dot(x, w1_ref[...], preferred_element_type=jnp.float32) + b1_ref[...]

    # ---- dropout(p=0.3), training semantics ----
    # mask holds 0.0 (dropped) or 1/(1-p) (kept) -> one VPU multiply.
    # TODO(synk): mask comes from jax.random, not torch's RNG stream, so the
    # exact dropout pattern differs from PyTorch (distributionally identical).
    h = h * mask_ref[...]

    # ---- ReLU ----
    h = jnp.maximum(h, 0.0)

    # ---- fc2: (TB, 256) @ (256, 128); padded cols have zero weight, -1e30 bias ----
    logits = jnp.dot(h, w2_ref[...], preferred_element_type=jnp.float32) + b2_ref[...]

    # ---- LogSoftmax(dim=1) over the full 128-lane slab ----
    # Padded lanes are ~-1e30: they never win the max and exp() underflows to 0,
    # so the normalization only sees the 10 real logits.
    m = jnp.max(logits, axis=-1, keepdims=True)
    lse = m + jnp.log(jnp.sum(jnp.exp(logits - m), axis=-1, keepdims=True))
    o_ref[...] = (logits - lse).astype(o_ref.dtype)


def prepare_params(w1, b1, w2, b2):
    """One-time pad / cast of torch-shaped params for the kernel."""
    w1p = jnp.zeros((K_PAD, HIDDEN_SIZES[0]), jnp.float32).at[:INPUT_SIZE].set(w1)
    w1p = w1p.astype(jnp.bfloat16)                        # dominant HBM traffic halved
    w2p = jnp.zeros((HIDDEN_SIZES[0], N_PAD), jnp.float32).at[:, :OUTPUT_SIZE].set(w2)
    b2p = jnp.full((1, N_PAD), NEG_BIG, jnp.float32).at[:, :OUTPUT_SIZE].set(b2)
    return w1p, b1.astype(jnp.float32), w2p, b2p


def feedforward(x, w1p, b1, w2p, b2p, dropout_key, training=True):
    B = x.shape[0]
    H1 = HIDDEN_SIZES[0]

    # Row tile: large enough to amortize per-step overhead and keep fc1 near the
    # HBM roofline at big B, small enough to fit v7x's 32 MiB scoped VMEM.
    TB = min(512, _round_up(B, 8))
    Bp = _round_up(B, TB)

    # Zero-pad batch rows and the contraction dim (sliced back off below).
    xp = jnp.zeros((Bp, K_PAD), jnp.float32).at[:B, :INPUT_SIZE].set(x)

    # Dropout keep-mask, pre-scaled by 1/(1-p); per-row, so each batch tile
    # naturally gets an independent mask.
    if training:
        keep = jax.random.bernoulli(dropout_key, 1.0 - P_DROP, (Bp, H1))
        mask = keep.astype(jnp.float32) * (1.0 / (1.0 - P_DROP))
    else:
        mask = jnp.ones((Bp, H1), jnp.float32)

    out = pl.pallas_call(
        ff_kernel,
        out_shape=jax.ShapeDtypeStruct((Bp, N_PAD), jnp.float32),
        grid=(Bp // TB,),
        in_specs=[
            pl.BlockSpec((TB, K_PAD), lambda i: (i, 0)),   # x: tiled over rows
            pl.BlockSpec((TB, H1),    lambda i: (i, 0)),   # dropout mask rows
            pl.BlockSpec((K_PAD, H1), lambda i: (0, 0)),   # W1: resident in VMEM
            pl.BlockSpec((1, H1),     lambda i: (0, 0)),   # b1: resident
            pl.BlockSpec((H1, N_PAD), lambda i: (0, 0)),   # W2: resident
            pl.BlockSpec((1, N_PAD),  lambda i: (0, 0)),   # b2: resident
        ],
        out_specs=pl.BlockSpec((TB, N_PAD), lambda i: (i, 0)),
        compiler_params=pltpu.CompilerParams(
            dimension_semantics=("parallel",)),            # shard rows over v7x TCs
    )(xp, mask, w1p, b1, w2p, b2p)

    return out[:B, :OUTPUT_SIZE]


def init_params(key):
    """Deterministic parameter init mirroring the torch module's shapes."""
    ks = jax.random.split(key, 12)

    def linear(kw, kb, fan_in, fan_out, xavier=False):
        if xavier:  # nn.init.xavier_normal_ on fc1.weight
            std = (2.0 / (fan_in + fan_out)) ** 0.5
            w = std * jax.random.normal(kw, (fan_in, fan_out), jnp.float32)
        else:       # torch default: U(-1/sqrt(fan_in), 1/sqrt(fan_in))
            bound = 1.0 / (fan_in ** 0.5)
            w = jax.random.uniform(kw, (fan_in, fan_out), jnp.float32,
                                   -bound, bound)
        bound = 1.0 / (fan_in ** 0.5)
        b = jax.random.uniform(kb, (1, fan_out), jnp.float32, -bound, bound)
        return w, b

    w1, b1 = linear(ks[0], ks[1], INPUT_SIZE, HIDDEN_SIZES[0], xavier=True)
    w2, b2 = linear(ks[2], ks[3], HIDDEN_SIZES[0], OUTPUT_SIZE)
    # fc3/fc4/fc5 exist in __init__ but are unused in forward(); init for parity.
    _w3, _b3 = linear(ks[4], ks[5], HIDDEN_SIZES[1], HIDDEN_SIZES[2])
    _w4, _b4 = linear(ks[6], ks[7], HIDDEN_SIZES[2], HIDDEN_SIZES[3])
    _w5, _b5 = linear(ks[8], ks[9], HIDDEN_SIZES[3], OUTPUT_SIZE)
    return w1, b1, w2, b2


def reference(x, w1, b1, w2, b2, mask):
    """Pure-JAX reference using the same bf16 fc1 path and the same mask."""
    h = jnp.dot(x.astype(jnp.bfloat16), w1.astype(jnp.bfloat16),
                preferred_element_type=jnp.float32) + b1
    h = jnp.maximum(h * mask, 0.0)
    logits = jnp.dot(h, w2, preferred_element_type=jnp.float32) + b2
    return jax.nn.log_softmax(logits, axis=-1)


if __name__ == "__main__":
    key = jax.random.PRNGKey(0)
    k_param, k_x, k_drop = jax.random.split(key, 3)

    w1, b1, w2, b2 = init_params(k_param)
    w1p, b1p, w2p, b2p = prepare_params(w1, b1, w2, b2)

    B = 8  # small batch; feature dim is fixed at 784 by the module
    x = jax.random.normal(k_x, (B, INPUT_SIZE), jnp.float32)

    out = feedforward(x, w1p, b1p, w2p, b2p, k_drop)
    out = jax.block_until_ready(out)

    # sanity 1: log-softmax rows must exponentiate to probability simplices
    row_sums = jnp.exp(out).sum(axis=1)
    assert out.shape == (B, OUTPUT_SIZE)
    assert bool(jnp.all(jnp.isfinite(out)))
    assert bool(jnp.allclose(row_sums, 1.0, atol=1e-4))

    # sanity 2: match a pure-JAX reference using the identical dropout mask
    keep = jax.random.bernoulli(k_drop, 1.0 - P_DROP,
                                (_round_up(B, min(512, _round_up(B, 8))),
                                 HIDDEN_SIZES[0]))
    mask = keep.astype(jnp.float32)[:B] * (1.0 / (1.0 - P_DROP))
    ref = reference(x, w1, b1, w2, b2, mask)
    assert bool(jnp.allclose(out, ref, atol=1e-3, rtol=1e-3))

    print("KERNEL_OK")
</pallas_src>

<mosaic_0001>
module attributes {stable_mosaic.version = 11 : i64} {
  func.func @ff_kernel(%arg0: i32, %arg1: memref<8x896xf32, #tpu.memory_space<vmem>>, %arg2: memref<8x256xf32, #tpu.memory_space<vmem>>, %arg3: memref<896x256xbf16, #tpu.memory_space<vmem>>, %arg4: memref<1x256xf32, #tpu.memory_space<vmem>>, %arg5: memref<256x128xf32, #tpu.memory_space<vmem>>, %arg6: memref<1x128xf32, #tpu.memory_space<vmem>>, %arg7: memref<8x128xf32, #tpu.memory_space<vmem>>) attributes {dimension_semantics = [#tpu.dimension_semantics<parallel>], iteration_bounds = array<i64: 1>, scalar_prefetch = 0 : i64, scratch_operands = 0 : i64, tpu.core_type = #tpu.core_type<tc>, window_params = [{transform_indices = @transform_0, window_bounds = array<i64: 8, 896>}, {transform_indices = @transform_1, window_bounds = array<i64: 8, 256>}, {pipeline_mode = #tpu.pipeline_mode<synchronous>, transform_indices = @transform_2, window_bounds = array<i64: 896, 256>}, {pipeline_mode = #tpu.pipeline_mode<synchronous>, transform_indices = @transform_3, window_bounds = array<i64: 1, 256>}, {pipeline_mode = #tpu.pipeline_mode<synchronous>, transform_indices = @transform_4, window_bounds = array<i64: 256, 128>}, {pipeline_mode = #tpu.pipeline_mode<synchronous>, transform_indices = @transform_5, window_bounds = array<i64: 1, 128>}, {transform_indices = @transform_6, window_bounds = array<i64: 8, 128>}]} {
    %c0 = arith.constant 0 : index
    %c0_0 = arith.constant 0 : index
    %0 = vector.load %arg1[%c0, %c0_0] : memref<8x896xf32, #tpu.memory_space<vmem>>, vector<8x896xf32>
    %1 = arith.truncf %0 : vector<8x896xf32> to vector<8x896xbf16>
    %c0_1 = arith.constant 0 : index
    %c0_2 = arith.constant 0 : index
    %2 = vector.load %arg3[%c0_1, %c0_2] : memref<896x256xbf16, #tpu.memory_space<vmem>>, vector<896x256xbf16>
    %cst = arith.constant dense<0.000000e+00> : vector<8x256xf32>
    %3 = tpu.matmul %1, %2, %cst {dimension_numbers = #tpu.dot_dimension_numbers<[1], [0], [0], [1], [0, 0, 1, 1], [], []>} : vector<8x896xbf16>, vector<896x256xbf16>, vector<8x256xf32> -> vector<8x256xf32>
    %c0_3 = arith.constant 0 : index
    %c0_4 = arith.constant 0 : index
    %4 = vector.load %arg4[%c0_3, %c0_4] : memref<1x256xf32, #tpu.memory_space<vmem>>, vector<1x256xf32>
    %5 = vector.broadcast %4 : vector<1x256xf32> to vector<8x256xf32>
    %6 = arith.addf %3, %5 : vector<8x256xf32>
    %c0_5 = arith.constant 0 : index
    %c0_6 = arith.constant 0 : index
    %7 = vector.load %arg2[%c0_5, %c0_6] : memref<8x256xf32, #tpu.memory_space<vmem>>, vector<8x256xf32>
    %8 = arith.mulf %6, %7 : vector<8x256xf32>
    %cst_7 = arith.constant 0.000000e+00 : f32
    %9 = vector.broadcast %cst_7 : f32 to vector<8x256xf32>
    %10 = arith.maximumf %8, %9 : vector<8x256xf32>
    %c0_8 = arith.constant 0 : index
    %c0_9 = arith.constant 0 : index
    %11 = vector.load %arg5[%c0_8, %c0_9] : memref<256x128xf32, #tpu.memory_space<vmem>>, vector<256x128xf32>
    %cst_10 = arith.constant dense<0.000000e+00> : vector<8x128xf32>
    %12 = tpu.matmul %10, %11, %cst_10 {dimension_numbers = #tpu.dot_dimension_numbers<[1], [0], [0], [1], [0, 0, 1, 1], [], []>} : vector<8x256xf32>, vector<256x128xf32>, vector<8x128xf32> -> vector<8x128xf32>
    %c0_11 = arith.constant 0 : index
    %c0_12 = arith.constant 0 : index
    %13 = vector.load %arg6[%c0_11, %c0_12] : memref<1x128xf32, #tpu.memory_space<vmem>>, vector<1x128xf32>
    %14 = vector.broadcast %13 : vector<1x128xf32> to vector<8x128xf32>
    %15 = arith.addf %12, %14 : vector<8x128xf32>
    %cst_13 = arith.constant dense<0xFF800000> : vector<8xf32>
    %16 = vector.multi_reduction <maximumf>, %15, %cst_13 [1] : vector<8x128xf32> to vector<8xf32>
    %17 = vector.shape_cast %16 : vector<8xf32> to vector<8x1xf32>
    %18 = vector.broadcast %17 : vector<8x1xf32> to vector<8x128xf32>
    %19 = arith.subf %15, %18 : vector<8x128xf32>
    %20 = math.exp %19 : vector<8x128xf32>
    %cst_14 = arith.constant dense<0.000000e+00> : vector<8xf32>
    %21 = vector.multi_reduction <add>, %20, %cst_14 [1] : vector<8x128xf32> to vector<8xf32>
    %22 = vector.shape_cast %21 : vector<8xf32> to vector<8x1xf32>
    %23 = math.log %22 : vector<8x1xf32>
    %24 = arith.addf %17, %23 : vector<8x1xf32>
    %25 = vector.broadcast %24 : vector<8x1xf32> to vector<8x128xf32>
    %26 = arith.subf %15, %25 : vector<8x128xf32>
    %c0_15 = arith.constant 0 : index
    %c0_16 = arith.constant 0 : index
    %27 = vector.load %arg7[%c0_15, %c0_16] : memref<8x128xf32, #tpu.memory_space<vmem>>, vector<8x128xf32>
    tpu.vector_store %arg7[%c0_15, %c0_16], %26 {strides = array<i32>} : memref<8x128xf32, #tpu.memory_space<vmem>>, vector<8x128xf32>,
    return
  }
  func.func @transform_0(%arg0: i32) -> (i32, i32) {
    %c0_i32 = arith.constant 0 : i32
    %c0_i32_0 = arith.constant 0 : i32
    return %arg0, %c0_i32 : i32, i32
  }
  func.func @transform_1(%arg0: i32) -> (i32, i32) {
    %c0_i32 = arith.constant 0 : i32
    %c0_i32_0 = arith.constant 0 : i32
    return %arg0, %c0_i32 : i32, i32
  }
  func.func @transform_2(%arg0: i32) -> (i32, i32) {
    %c0_i32 = arith.constant 0 : i32
    %c0_i32_0 = arith.constant 0 : i32
    %c0_i32_1 = arith.constant 0 : i32
    return %c0_i32, %c0_i32_0 : i32, i32
  }
  func.func @transform_3(%arg0: i32) -> (i32, i32) {
    %c0_i32 = arith.constant 0 : i32
    %c0_i32_0 = arith.constant 0 : i32
    %c0_i32_1 = arith.constant 0 : i32
    return %c0_i32, %c0_i32_0 : i32, i32
  }
  func.func @transform_4(%arg0: i32) -> (i32, i32) {
    %c0_i32 = arith.constant 0 : i32
    %c0_i32_0 = arith.constant 0 : i32
    %c0_i32_1 = arith.constant 0 : i32
    return %c0_i32, %c0_i32_0 : i32, i32
  }
  func.func @transform_5(%arg0: i32) -> (i32, i32) {
    %c0_i32 = arith.constant 0 : i32
    %c0_i32_0 = arith.constant 0 : i32
    %c0_i32_1 = arith.constant 0 : i32
    return %c0_i32, %c0_i32_0 : i32, i32
  }
  func.func @transform_6(%arg0: i32) -> (i32, i32) {
    %c0_i32 = arith.constant 0 : i32
    %c0_i32_0 = arith.constant 0 : i32
    return %arg0, %c0_i32 : i32, i32
  }
}

</mosaic_0001>

<bundles_post_ra>
// kernel: tpu_custom_call.1
= control target key start
LH: loop header
LB: loop body
LE: loop exit
PB: predicated region body
PF: predicated region fallthrough
CT: control target
= control target key end

     0   :  { %11 = vsyncpa [#allocation3], 0  ;;  %s1582_s0 = inlined_call_operand.hbm [shape: f32[8,896], index: 0, kind: input, shape index: {}]   ;;  %s1583_s1 = inlined_call_operand.hbm [shape: f32[8,256], index: 1, kind: input, shape index: {}]   ;;  %s1584_s2 = inlined_call_operand.hbm [shape: bf16[896,256], index: 2, kind: input, shape index: {}]   ;;  %s1585_s3 = inlined_call_operand.vmem [shape: f32[1,256], index: 3, kind: input, shape index: {}]   ;;  %s1586_s4 = inlined_call_operand.hbm [shape: f32[256,128], index: 4, kind: input, shape index: {}]   ;;  %s1587_s5 = inlined_call_operand.vmem [shape: f32[1,128], index: 5, kind: input, shape index: {}]   ;;  %s1588_s6 = inlined_call_operand.hbm [shape: f32[8,128], index: 6, kind: output, shape index: {}]  }
   0x1   :  { %12 = vsyncpa [#allocation6], 0 }
   0x2   :  { %13 = vsyncpa [#allocation9], 0 }
   0x3   :  { %14 = vsyncpa [#allocation4], 0  ;;  %s1518_s21 = smov [#allocation5]   ;;  %s1519_s23 = smov [#allocation2]  }
   0x4   :  { %s31_s22 = sshll.u32 %s1518_s21, 4  ;;  %s21_s24 = sshll.u32 %s1519_s23, 4  ;;  %s32_s22 = int_to_ptr.vmem [resolvable:$true] %s31_s22  ;;  %s22_s24 = int_to_ptr.vmem [resolvable:$true] %s21_s24 }
   0x5   :  { %s1418_s25 = scalar_lea.vmem %s32_s22, 256  ;;  %p1423_p1 = scmp.lt.s32.totalorder %s32_s22, %s32_s22 }
   0x6   :  { %p1419_p0 = scmp.ne.s32.totalorder %s32_s22, %s1418_s25  ;;  %p1424_p2 = scmp.lt.s32.totalorder %s1418_s25, %s1418_s25 }
   0x8   :  { %p1425_p3 = por %p1424_p2, %p1423_p1 }
   0xa   :  { %p1426_p4 = pnand %p1425_p3, %p1419_p0 }
   0xc   :  { %1429 = shalt.err (!%p1426_p4)
}
   0xd   :  { %34 = dma.hbm_to_vmem [thread:$0]  %s1583_s1, 256, %s32_s22, [#allocation6]  }
   0xe   :  { %s1438_s28 = scalar_lea.vmem %s22_s24, 896  ;;  %p1443_p6 = scmp.lt.s32.totalorder %s22_s24, %s22_s24 }
   0xf   :  { %p1439_p5 = scmp.ne.s32.totalorder %s22_s24, %s1438_s28  ;;  %p1444_p7 = scmp.lt.s32.totalorder %s1438_s28, %s1438_s28 }
  0x11   :  { %p1445_p8 = por %p1444_p7, %p1443_p6 }
  0x13   :  { %p1446_p9 = pnand %p1445_p8, %p1439_p5 }
  0x15   :  { %1449 = shalt.err (!%p1446_p9)
}
  0x16   :  { %24 = dma.hbm_to_vmem [thread:$0]  %s1582_s0, 896, %s22_s24, [#allocation3]  }
  0x17   :  { %s1520_s7 = smov [#allocation7]  }
  0x18   :  { %s40_s8 = sshll.u32 %s1520_s7, 4  ;;  %s41_s8 = int_to_ptr.vmem [resolvable:$true] %s40_s8 }
  0x19   :  { %s1458_s9 = scalar_lea.vmem %s41_s8, 14336  ;;  %p1463_p11 = scmp.lt.s32.totalorder %s41_s8, %s41_s8 }
  0x1a   :  { %p1459_p10 = scmp.ne.s32.totalorder %s41_s8, %s1458_s9  ;;  %p1464_p12 = scmp.lt.s32.totalorder %s1458_s9, %s1458_s9 }
  0x1c   :  { %p1465_p13 = por %p1464_p12, %p1463_p11 }
  0x1e   :  { %p1466_p0 = pnand %p1465_p13, %p1459_p10 }
  0x20   :  { %1469 = shalt.err (!%p1466_p0)
}
  0x21   :  { %s1521_s1 = smov 128   ;;  %s1522_s10 = smov 8  }
  0x22   :  { %46 = dma.hbm_to_vmem [thread:$0]  %s1584_s2, 14336, %s41_s8, [#allocation6], %s1521_s1, %s1521_s1, %s1522_s10  }
  0x23   :  { %s1523_s13 = smov [#allocation8]  }
  0x24   :  { %s54_s14 = sshll.u32 %s1523_s13, 4  ;;  %s55_s14 = int_to_ptr.vmem [resolvable:$true] %s54_s14 }
  0x25   :  { %s1478_s0 = scalar_lea.vmem %s55_s14, 4096  ;;  %p1483_p2 = scmp.lt.s32.totalorder %s55_s14, %s55_s14 }
  0x26   :  { %p1479_p1 = scmp.ne.s32.totalorder %s55_s14, %s1478_s0  ;;  %p1484_p3 = scmp.lt.s32.totalorder %s1478_s0, %s1478_s0 }
  0x28   :  { %p1485_p4 = por %p1484_p3, %p1483_p2 }
  0x2a   :  { %p1486_p5 = pnand %p1485_p4, %p1479_p1 }
  0x2c   :  { %1489 = shalt.err (!%p1486_p5)
}
  0x2d   :  { %60 = dma.hbm_to_vmem [thread:$0]  %s1586_s4, 4096, %s55_s14, [#allocation9], %s1521_s1, %s1521_s1, %s1522_s10  }
  0x2e   :  { %1510 = dma.done.wait [#allocation3], 896  }
  0x2f   :  { %1511 = vsyncadd [#allocation3], 4294966400 }
  0x30   :  { %1512 = dma.done.wait [#allocation6], 14592  }
  0x31   :  { %1513 = vsyncadd [#allocation6], 4294952704 }
  0x32   :  { %1514 = dma.done.wait [#allocation9], 4096  }
  0x33   :  { %1515 = vsyncadd [#allocation9], 4294963200  ;;  %v1238_v0 = vld [vmem:[#allocation7 + $0x74] ss:$8 sps:$4 sm:$0xff]   ;;  %v1240_v1 = vld [vmem:[#allocation7 + $0x70] ss:$8 sps:$4 sm:$0xff]  }
  0x34   :  { %774 = vmatprep.subr.bf16.mxu0 %v1238_v0  ;;  %v1241_v2 = vld [vmem:[#allocation7 + $0x174] ss:$8 sps:$4 sm:$0xff]   ;;  %v1243_v3 = vld [vmem:[#allocation7 + $0x170] ss:$8 sps:$4 sm:$0xff]   ;;  %v1244_v4 = vld [vmem:[#allocation7 + $0x64] ss:$8 sps:$4 sm:$0xff]  }
  0x35   :  { %775 = vmatpush1.bf16.msra.mxu0 %v1240_v1  ;;  %v1246_v5 = vld [vmem:[#allocation7 + $0x60] ss:$8 sps:$4 sm:$0xff]   ;;  %815 = vmatprep.subr.bf16.mxu1 %v1241_v2  ;;  %v1247_v6 = vld [vmem:[#allocation7 + $0x164] ss:$8 sps:$4 sm:$0xff]   ;;  %v1250_v8 = vld [vmem:[#allocation7 + $0x54] ss:$8 sps:$4 sm:$0xff]  }
  0x36   :  { %816 = vmatpush1.bf16.msra.mxu1 %v1243_v3  ;;  %776 = vmatprep.subr.bf16.mxu0 %v1244_v4  ;;  %v1249_v7 = vld [vmem:[#allocation7 + $0x160] ss:$8 sps:$4 sm:$0xff]   ;;  %v1252_v9 = vld [vmem:[#allocation7 + $0x50] ss:$8 sps:$4 sm:$0xff]   ;;  %v1253_v10 = vld [vmem:[#allocation7 + $0x154] ss:$8 sps:$4 sm:$0xff]  }
  0x37   :  { %817 = vmatprep.subr.bf16.mxu1 %v1247_v6  ;;  %v1256_v11 = vld [vmem:[#allocation7 + $0x44] ss:$8 sps:$4 sm:$0xff]   ;;  %v1255_v12 = vld [vmem:[#allocation7 + $0x150] ss:$8 sps:$4 sm:$0xff]   ;;  %v1258_v14 = vld [vmem:[#allocation7 + $0x40] ss:$8 sps:$4 sm:$0xff]  }
  0x38   :  { %v1259_v13 = vld [vmem:[#allocation7 + $0x144] ss:$8 sps:$4 sm:$0xff]   ;;  %v1262_v15 = vld [vmem:[#allocation7 + $0x34] ss:$8 sps:$4 sm:$0xff]   ;;  %v1261_v16 = vld [vmem:[#allocation7 + $0x140] ss:$8 sps:$4 sm:$0xff]  }
  0x39   :  { %777 = vmatpush1.bf16.msra.mxu0 %v1246_v5  ;;  %v1265_v17 = vld [vmem:[#allocation7 + $0x134] ss:$8 sps:$4 sm:$0xff]   ;;  %v1264_v18 = vld [vmem:[#allocation7 + $0x30] ss:$8 sps:$4 sm:$0xff]   ;;  %v1268_v19 = vld [vmem:[#allocation7 + $0x24] ss:$8 sps:$4 sm:$0xff]  }
  0x3a   :  { %778 = vmatprep.subr.bf16.mxu0 %v1250_v8  ;;  %818 = vmatpush1.bf16.msra.mxu1 %v1249_v7  ;;  %v1267_v20 = vld [vmem:[#allocation7 + $0x130] ss:$8 sps:$4 sm:$0xff]   ;;  %v1271_v21 = vld [vmem:[#allocation7 + $0x124] ss:$8 sps:$4 sm:$0xff]   ;;  %v1270_v22 = vld [vmem:[#allocation7 + $0x20] ss:$8 sps:$4 sm:$0xff]  }
  0x3b   :  { %819 = vmatprep.subr.bf16.mxu1 %v1253_v10  ;;  %v1274_v23 = vld [vmem:[#allocation7 + $0x14] ss:$8 sps:$4 sm:$0xff]   ;;  %v1273_v24 = vld [vmem:[#allocation7 + $0x120] ss:$8 sps:$4 sm:$0xff]   ;;  %v1276_v26 = vld [vmem:[#allocation7 + $0x10] ss:$8 sps:$4 sm:$0xff]  }
  0x3c   :  { %v1277_v25 = vld [vmem:[#allocation7 + $0x114] ss:$8 sps:$4 sm:$0xff]   ;;  %v1280_v27 = vld [vmem:[#allocation7 + $0x4] ss:$8 sps:$4 sm:$0xff]   ;;  %v1279_v28 = vld [vmem:[#allocation7 + $0x110] ss:$8 sps:$4 sm:$0xff]  }
  0x3d   :  { %779 = vmatpush1.bf16.msra.mxu0 %v1252_v9  ;;  %v1283_v29 = vld [vmem:[#allocation7 + $0x104] ss:$8 sps:$4 sm:$0xff]   ;;  %v1282_v30 = vld [vmem:[#allocation7] ss:$8 sps:$4 sm:$0xff]   ;;  %v1286_v31 = vld [vmem:[#allocation7 + $0xf4] ss:$8 sps:$4 sm:$0xff]  }
  0x3e   :  { %780 = vmatprep.subr.bf16.mxu0 %v1256_v11  ;;  %820 = vmatpush1.bf16.msra.mxu1 %v1255_v12  ;;  %v1285_v32 = vld [vmem:[#allocation7 + $0x100] ss:$8 sps:$4 sm:$0xff]   ;;  %v1289_v33 = vld [vmem:[#allocation7 + $0x1f4] ss:$8 sps:$4 sm:$0xff]   ;;  %v1288_v34 = vld [vmem:[#allocation7 + $0xf0] ss:$8 sps:$4 sm:$0xff]  }
  0x3f   :  { %821 = vmatprep.subr.bf16.mxu1 %v1259_v13  ;;  %v1292_v35 = vld [vmem:[#allocation7 + $0xe4] ss:$8 sps:$4 sm:$0xff]   ;;  %v1291_v36 = vld [vmem:[#allocation7 + $0x1f0] ss:$8 sps:$4 sm:$0xff]   ;;  %v1294_v38 = vld [vmem:[#allocation7 + $0xe0] ss:$8 sps:$4 sm:$0xff]  }
  0x40   :  { %v1295_v37 = vld [vmem:[#allocation7 + $0x1e4] ss:$8 sps:$4 sm:$0xff]   ;;  %v1298_v39 = vld [vmem:[#allocation7 + $0xd4] ss:$8 sps:$4 sm:$0xff]   ;;  %v1297_v40 = vld [vmem:[#allocation7 + $0x1e0] ss:$8 sps:$4 sm:$0xff]  }
  0x41   :  { %781 = vmatpush1.bf16.msra.mxu0 %v1258_v14  ;;  %v1301_v41 = vld [vmem:[#allocation7 + $0x1d4] ss:$8 sps:$4 sm:$0xff]   ;;  %v1300_v42 = vld [vmem:[#allocation7 + $0xd0] ss:$8 sps:$4 sm:$0xff]   ;;  %v1304_v43 = vld [vmem:[#allocation7 + $0xc4] ss:$8 sps:$4 sm:$0xff]  }
  0x42   :  { %782 = vmatprep.subr.bf16.mxu0 %v1262_v15  ;;  %822 = vmatpush1.bf16.msra.mxu1 %v1261_v16  ;;  %v1303_v44 = vld [vmem:[#allocation7 + $0x1d0] ss:$8 sps:$4 sm:$0xff]   ;;  %v1307_v45 = vld [vmem:[#allocation7 + $0x1c4] ss:$8 sps:$4 sm:$0xff]   ;;  %v1306_v47 = vld [vmem:[#allocation7 + $0xc0] ss:$8 sps:$4 sm:$0xff]  }
  0x43   :  { %823 = vmatprep.subr.bf16.mxu1 %v1265_v17  ;;  %v77_v46 = vld [vmem:[#allocation2 + $0x8] sm:$0xff]  ;;  %v1310_v49 = vld [vmem:[#allocation7 + $0xb4] ss:$8 sps:$4 sm:$0xff]   ;;  %v1312_v54 = vld [vmem:[#allocation7 + $0xb0] ss:$8 sps:$4 sm:$0xff]   ;;  %v1524_v17 = vmov 0  }
  0x44   :  { %v84_v48 = vpack.c.bf16 %v77_v46, %v77_v46  ;;  %v79_v50 = vld [vmem:[#allocation2 + $0x18] sm:$0xff]  ;;  %v1309_v51 = vld [vmem:[#allocation7 + $0x1c0] ss:$8 sps:$4 sm:$0xff]   ;;  %v1316_v55 = vld [vmem:[#allocation7 + $0xa4] ss:$8 sps:$4 sm:$0xff]   ;;  %s1525_s18 = smov [#allocation10]  }
  0x45   :  { %783 = vmatpush1.bf16.msra.mxu0 %v1264_v18  ;;  %v86_v52 = vpack.c.bf16 %v79_v50, %v79_v50  ;;  %v1313_v53 = vld [vmem:[#allocation7 + $0x1b4] ss:$8 sps:$4 sm:$0xff]   ;;  %v1315_v56 = vld [vmem:[#allocation7 + $0x1b0] ss:$8 sps:$4 sm:$0xff]   ;;  %v1319_v57 = vld [vmem:[#allocation7 + $0x1a4] ss:$8 sps:$4 sm:$0xff]  }
  0x46   :  { %784 = vmatprep.subr.bf16.mxu0 %v1268_v19  ;;  %824 = vmatpush1.bf16.msra.mxu1 %v1267_v20  ;;  %v1318_v58 = vld [vmem:[#allocation7 + $0xa0] ss:$8 sps:$4 sm:$0xff]   ;;  %v1322_v59 = vld [vmem:[#allocation7 + $0x94] ss:$8 sps:$4 sm:$0xff]   ;;  %v1324_v62 = vld [vmem:[#allocation7 + $0x90] ss:$8 sps:$4 sm:$0xff]  }
  0x47   :  { %825 = vmatprep.subr.bf16.mxu1 %v1271_v21  ;;  %806 = vmatprep.mubr.bf16.mxu0 %v84_v48  ;;  %v1321_v60 = vld [vmem:[#allocation7 + $0x1a0] ss:$8 sps:$4 sm:$0xff]   ;;  %v1325_v61 = vld [vmem:[#allocation7 + $0x194] ss:$8 sps:$4 sm:$0xff]   ;;  %v1328_v63 = vld [vmem:[#allocation7 + $0x84] ss:$8 sps:$4 sm:$0xff]  }
  0x48   :  { %847 = vmatprep.mubr.bf16.mxu1 %v86_v52  ;;  %v1327_v0 = vld [vmem:[#allocation7 + $0x190] ss:$8 sps:$4 sm:$0xff]   ;;  %v1330_v1 = vld [vmem:[#allocation7 + $0x80] ss:$8 sps:$4 sm:$0xff]   ;;  %v1331_v2 = vld [vmem:[#allocation7 + $0x184] ss:$8 sps:$4 sm:$0xff]  }
  0x49   :  { %785 = vmatpush1.bf16.msra.mxu0 %v1270_v22  ;;  %v1333_v3 = vld [vmem:[#allocation7 + $0x180] ss:$8 sps:$4 sm:$0xff]   ;;  %v76_v4 = vld [vmem:[#allocation2] sm:$0xff]  ;;  %v1339_v11 = vld [vmem:[#allocation7 + $0x264] ss:$8 sps:$4 sm:$0xff]   ;;  %s1071_s19 = sshll.u32 %s1525_s18, 4  ;;  %s1072_s19 = int_to_ptr.vmem [resolvable:$true] %s1071_s19 }
  0x4a   :  { %786 = vmatprep.subr.bf16.mxu0 %v1274_v23  ;;  %826 = vmatpush1.bf16.msra.mxu1 %v1273_v24  ;;  %v1336_v5 = vld [vmem:[#allocation7 + $0x274] ss:$8 sps:$4 sm:$0xff]   ;;  %v78_v6 = vld [vmem:[#allocation2 + $0x10] sm:$0xff]  ;;  %v83_v7 = vpack.c.bf16 %v76_v4, %v76_v4  ;;  %v1334_v9 = vld [vmem:[#allocation7 + $0x270] ss:$8 sps:$4 sm:$0xff]   ;;  %p1495_p7 = scmp.lt.s32.totalorder %s1072_s19, %s1072_s19 }
  0x4b   :  { %827 = vmatprep.subr.bf16.mxu1 %v1277_v25  ;;  %v1360_v8 = vld [vmem:[#allocation7 + $0x374] ss:$8 sps:$4 sm:$0xff]   ;;  %v85_v10 = vpack.c.bf16 %v78_v6, %v78_v6  ;;  %v1358_v12 = vld [vmem:[#allocation7 + $0x370] ss:$8 sps:$4 sm:$0xff]   ;;  %v1366_v13 = vld [vmem:[#allocation7 + $0x364] ss:$8 sps:$4 sm:$0xff]  }
  0x4c   :  { %v1337_v14 = vld [vmem:[#allocation7 + $0x260] ss:$8 sps:$4 sm:$0xff]   ;;  %v1342_v15 = vld [vmem:[#allocation7 + $0x254] ss:$8 sps:$4 sm:$0xff]   ;;  %v1340_v19 = vld [vmem:[#allocation7 + $0x250] ss:$8 sps:$4 sm:$0xff]  }
  0x4d   :  { %787 = vmatpush1.bf16.msra.mxu0 %v1276_v26  ;;  %v1364_v16 = vld [vmem:[#allocation7 + $0x360] ss:$8 sps:$4 sm:$0xff]   ;;  %v1372_v18 = vld [vmem:[#allocation7 + $0x354] ss:$8 sps:$4 sm:$0xff]   ;;  %v1345_v20 = vld [vmem:[#allocation7 + $0x244] ss:$8 sps:$4 sm:$0xff]  }
  0x4e   :  { %788 = vmatprep.subr.bf16.mxu0 %v1280_v27  ;;  %828 = vmatpush1.bf16.msra.mxu1 %v1279_v28  ;;  %v1370_v21 = vld [vmem:[#allocation7 + $0x350] ss:$8 sps:$4 sm:$0xff]   ;;  %v1378_v22 = vld [vmem:[#allocation7 + $0x344] ss:$8 sps:$4 sm:$0xff]   ;;  %v1343_v23 = vld [vmem:[#allocation7 + $0x240] ss:$8 sps:$4 sm:$0xff]  }
  0x4f   :  { %829 = vmatprep.subr.bf16.mxu1 %v1283_v29  ;;  %v1348_v24 = vld [vmem:[#allocation7 + $0x234] ss:$8 sps:$4 sm:$0xff]   ;;  %v81_v25 = vld [vmem:[#allocation2 + $0x28] sm:$0xff]  ;;  %v1346_v29 = vld [vmem:[#allocation7 + $0x230] ss:$8 sps:$4 sm:$0xff]  }
  0x50   :  { %v1376_v26 = vld [vmem:[#allocation7 + $0x340] ss:$8 sps:$4 sm:$0xff]   ;;  %v88_v27 = vpack.c.bf16 %v81_v25, %v81_v25  ;;  %v1384_v28 = vld [vmem:[#allocation7 + $0x334] ss:$8 sps:$4 sm:$0xff]   ;;  %v1369_v46 = vld [vmem:[#allocation7 + $0x2e4] ss:$8 sps:$4 sm:$0xff]  }
  0x51   :  { %789 = vmatpush1.bf16.msra.mxu0 %v1282_v30  ;;  %v1351_v30 = vld [vmem:[#allocation7 + $0x224] ss:$8 sps:$4 sm:$0xff]   ;;  %v1367_v48 = vld [vmem:[#allocation7 + $0x2e0] ss:$8 sps:$4 sm:$0xff]   ;;  %v1373_v50 = vld [vmem:[#allocation7 + $0x2d0] ss:$8 sps:$4 sm:$0xff]  }
  0x52   :  { %790 = vmatprep.subr.bf16.mxu0 %v1286_v31  ;;  %830 = vmatpush1.bf16.msra.mxu1 %v1285_v32  ;;  %v1382_v31 = vld [vmem:[#allocation7 + $0x330] ss:$8 sps:$4 sm:$0xff]   ;;  %v1390_v32 = vld [vmem:[#allocation7 + $0x324] ss:$8 sps:$4 sm:$0xff]   ;;  %v1379_v52 = vld [vmem:[#allocation7 + $0x2c0] ss:$8 sps:$4 sm:$0xff]  }
  0x53   :  { %831 = vmatprep.subr.bf16.mxu1 %v1289_v33  ;;  %v1349_v33 = vld [vmem:[#allocation7 + $0x220] ss:$8 sps:$4 sm:$0xff]   ;;  %v962_v25 = vld [vmem:[#allocation8 + $0x90] sm:$0xff] }
  0x54   :  { %v957_v4 = vld [vmem:[#allocation8 + $0x68] sm:$0xff]  ;;  %v956_v6 = vld [vmem:[#allocation8 + $0x60] sm:$0xff] }
  0x55   :  { %791 = vmatpush2.bf16.msra.mxu0 %v1288_v34  ;;  %v1354_v34 = vld [vmem:[#allocation7 + $0x214] ss:$8 sps:$4 sm:$0xff]  }
  0x56   :  { %792 = vmatprep.subr.bf16.mxu0 %v1292_v35  ;;  %832 = vmatpush2.bf16.msra.mxu1 %v1291_v36  ;;  %v1388_v35 = vld [vmem:[#allocation7 + $0x320] ss:$8 sps:$4 sm:$0xff]   ;;  %v1396_v36 = vld [vmem:[#allocation7 + $0x314] ss:$8 sps:$4 sm:$0xff]  }
  0x57   :  { %833 = vmatprep.subr.bf16.mxu1 %v1295_v37  ;;  %v1352_v37 = vld [vmem:[#allocation7 + $0x210] ss:$8 sps:$4 sm:$0xff]  }
  0x59   :  { %793 = vmatpush2.bf16.msra.mxu0 %v1294_v38  ;;  %v1357_v38 = vld [vmem:[#allocation7 + $0x204] ss:$8 sps:$4 sm:$0xff]  }
  0x5a   :  { %794 = vmatprep.subr.bf16.mxu0 %v1298_v39  ;;  %834 = vmatpush2.bf16.msra.mxu1 %v1297_v40  ;;  %v1394_v39 = vld [vmem:[#allocation7 + $0x310] ss:$8 sps:$4 sm:$0xff]   ;;  %v1402_v40 = vld [vmem:[#allocation7 + $0x304] ss:$8 sps:$4 sm:$0xff]  }
  0x5b   :  { %835 = vmatprep.subr.bf16.mxu1 %v1301_v41  ;;  %v1355_v41 = vld [vmem:[#allocation7 + $0x200] ss:$8 sps:$4 sm:$0xff]  }
  0x5d   :  { %795 = vmatpush2.bf16.msra.mxu0 %v1300_v42  ;;  %v1363_v42 = vld [vmem:[#allocation7 + $0x2f4] ss:$8 sps:$4 sm:$0xff]  }
  0x5e   :  { %796 = vmatprep.subr.bf16.mxu0 %v1304_v43  ;;  %836 = vmatpush2.bf16.msra.mxu1 %v1303_v44  ;;  %v1400_v43 = vld [vmem:[#allocation7 + $0x300] ss:$8 sps:$4 sm:$0xff]  }
  0x5f   :  { %837 = vmatprep.subr.bf16.mxu1 %v1307_v45  ;;  %v82_v44 = vld [vmem:[#allocation2 + $0x30] sm:$0xff]  ;;  %v1361_v45 = vld [vmem:[#allocation7 + $0x2f0] ss:$8 sps:$4 sm:$0xff]  }
  0x61   :  { %797 = vmatpush2.bf16.msra.mxu0 %v1306_v47  ;;  %v89_v47 = vpack.c.bf16 %v82_v44, %v82_v44 }
  0x62   :  { %798 = vmatprep.subr.bf16.mxu0 %v1310_v49  ;;  %838 = vmatpush2.bf16.msra.mxu1 %v1309_v51  ;;  %v1375_v49 = vld [vmem:[#allocation7 + $0x2d4] ss:$8 sps:$4 sm:$0xff]   ;;  %v1381_v51 = vld [vmem:[#allocation7 + $0x2c4] ss:$8 sps:$4 sm:$0xff]  }
  0x63   :  { %839 = vmatprep.subr.bf16.mxu1 %v1313_v53  ;;  %v1387_v53 = vld [vmem:[#allocation7 + $0x2b4] ss:$8 sps:$4 sm:$0xff]  }
  0x65   :  { %799 = vmatpush2.bf16.msra.mxu0 %v1312_v54  ;;  %v1385_v54 = vld [vmem:[#allocation7 + $0x2b0] ss:$8 sps:$4 sm:$0xff]  }
  0x66   :  { %800 = vmatprep.subr.bf16.mxu0 %v1316_v55  ;;  %840 = vmatpush2.bf16.msra.mxu1 %v1315_v56  ;;  %v1393_v55 = vld [vmem:[#allocation7 + $0x2a4] ss:$8 sps:$4 sm:$0xff]   ;;  %v1391_v56 = vld [vmem:[#allocation7 + $0x2a0] ss:$8 sps:$4 sm:$0xff]  }
  0x67   :  { %841 = vmatprep.subr.bf16.mxu1 %v1319_v57  ;;  %v1399_v57 = vld [vmem:[#allocation7 + $0x294] ss:$8 sps:$4 sm:$0xff]  }
  0x69   :  { %801 = vmatpush2.bf16.msra.mxu0 %v1318_v58  ;;  %v1397_v58 = vld [vmem:[#allocation7 + $0x290] ss:$8 sps:$4 sm:$0xff]  }
  0x6a   :  { %802 = vmatprep.subr.bf16.mxu0 %v1322_v59  ;;  %842 = vmatpush2.bf16.msra.mxu1 %v1321_v60  ;;  %v1405_v59 = vld [vmem:[#allocation7 + $0x284] ss:$8 sps:$4 sm:$0xff]   ;;  %v1403_v60 = vld [vmem:[#allocation7 + $0x280] ss:$8 sps:$4 sm:$0xff]  }
  0x6b   :  { %843 = vmatprep.subr.bf16.mxu1 %v1325_v61  ;;  %v80_v61 = vld [vmem:[#allocation2 + $0x20] sm:$0xff] }
  0x6d   :  { %803 = vmatpush2.bf16.msra.mxu0 %v1324_v62  ;;  %v87_v62 = vpack.c.bf16 %v80_v61, %v80_v61  ;;  %v939_v61 = vld [vmem:[#allocation5 + $0x8] sm:$0xff] }
  0x6e   :  { %804 = vmatprep.subr.bf16.mxu0 %v1328_v63  ;;  %844 = vmatpush2.bf16.msra.mxu1 %v1327_v0  ;;  %v975_v63 = vld [vmem:[#allocation8 + $0xf8] sm:$0xff] }
  0x6f   :  { %845 = vmatprep.subr.bf16.mxu1 %v1331_v2  ;;  %v959_v0 = vld [vmem:[#allocation8 + $0x78] sm:$0xff]  ;;  %v958_v2 = vld [vmem:[#allocation8 + $0x70] sm:$0xff] }
  0x71   :  { %805 = vmatpush2.bf16.msra.mxu0 %v1330_v1  ;;  %v974_v1 = vld [vmem:[#allocation8 + $0xf0] sm:$0xff] }
  0x72   :  { %856 = vmatprep.subr.bf16.mxu0 %v1336_v5  ;;  %846 = vmatpush2.bf16.msra.mxu1 %v1333_v3  ;;  %v973_v3 = vld [vmem:[#allocation8 + $0xe8] sm:$0xff]  ;;  %v972_v5 = vld [vmem:[#allocation8 + $0xe0] sm:$0xff] }
  0x73   :  { %897 = vmatprep.subr.bf16.mxu1 %v1360_v8  ;;  %v955_v8 = vld [vmem:[#allocation8 + $0x58] sm:$0xff] }
  0x74   :  { %807 = vmatmul.mubr.bf16.vlgmr.msra.gmra.mxu0 %v83_v7  ;;  %v971_v7 = vld [vmem:[#allocation8 + $0xd8] sm:$0xff] }
  0x75   :  { %857 = vmatpush1.bf16.msra.mxu0 %v1334_v9  ;;  %848 = vmatmul.mubr.bf16.vlgmr.msra.gmra.mxu1 %v85_v10  ;;  %v970_v9 = vld [vmem:[#allocation8 + $0xd0] sm:$0xff] }
  0x76   :  { %858 = vmatprep.subr.bf16.mxu0 %v1339_v11  ;;  %898 = vmatpush1.bf16.msra.mxu1 %v1358_v12  ;;  %v954_v10 = vld [vmem:[#allocation8 + $0x50] sm:$0xff]  ;;  %v969_v11 = vld [vmem:[#allocation8 + $0xc8] sm:$0xff] }
  0x77   :  { %929 = vmatprep.mubr.bf16.mxu1 %v1524_v17  ;;  %899 = vmatprep.subr.bf16.mxu1 %v1366_v13  ;;  %v953_v12 = vld [vmem:[#allocation8 + $0x48] sm:$0xff]  ;;  %v968_v13 = vld [vmem:[#allocation8 + $0xc0] sm:$0xff]  ;;  %v966_v17 = vld [vmem:[#allocation8 + $0xb0] sm:$0xff] }
  0x78   :  { %888 = vmatprep.mubr.bf16.mxu0 %v88_v27  ;;  %v961_v27 = vld [vmem:[#allocation8 + $0x88] sm:$0xff] }
  0x79   :  { %859 = vmatpush1.bf16.msra.mxu0 %v1337_v14  ;;  %v952_v14 = vld [vmem:[#allocation8 + $0x40] sm:$0xff] }
  0x7a   :  { %860 = vmatprep.subr.bf16.mxu0 %v1342_v15  ;;  %900 = vmatpush1.bf16.msra.mxu1 %v1364_v16  ;;  %v967_v15 = vld [vmem:[#allocation8 + $0xb8] sm:$0xff] }
  0x7b   :  { %901 = vmatprep.subr.bf16.mxu1 %v1372_v18  ;;  %v951_v16 = vld [vmem:[#allocation8 + $0x38] sm:$0xff]  ;;  %v950_v18 = vld [vmem:[#allocation8 + $0x30] sm:$0xff] }
  0x7d   :  { %861 = vmatpush1.bf16.msra.mxu0 %v1340_v19  ;;  %v965_v19 = vld [vmem:[#allocation8 + $0xa8] sm:$0xff] }
  0x7e   :  { %862 = vmatprep.subr.bf16.mxu0 %v1345_v20  ;;  %902 = vmatpush1.bf16.msra.mxu1 %v1370_v21  ;;  %v949_v20 = vld [vmem:[#allocation8 + $0x28] sm:$0xff]  ;;  %v964_v21 = vld [vmem:[#allocation8 + $0xa0] sm:$0xff] }
  0x7f   :  { %903 = vmatprep.subr.bf16.mxu1 %v1378_v22  ;;  %v948_v22 = vld [vmem:[#allocation8 + $0x20] sm:$0xff] }
  0x81   :  { %863 = vmatpush1.bf16.msra.mxu0 %v1343_v23  ;;  %v963_v23 = vld [vmem:[#allocation8 + $0x98] sm:$0xff] }
  0x82   :  { %864 = vmatprep.subr.bf16.mxu0 %v1348_v24  ;;  %904 = vmatpush1.bf16.msra.mxu1 %v1376_v26  ;;  %v947_v24 = vld [vmem:[#allocation8 + $0x18] sm:$0xff]  ;;  %v946_v26 = vld [vmem:[#allocation8 + $0x10] sm:$0xff] }
  0x83   :  { %905 = vmatprep.subr.bf16.mxu1 %v1384_v28  ;;  %v945_v28 = vld [vmem:[#allocation8 + $0x8] sm:$0xff] }
  0x85   :  { %865 = vmatpush1.bf16.msra.mxu0 %v1346_v29  ;;  %v960_v29 = vld [vmem:[#allocation8 + $0x80] sm:$0xff] }
  0x86   :  { %866 = vmatprep.subr.bf16.mxu0 %v1351_v30  ;;  %906 = vmatpush1.bf16.msra.mxu1 %v1382_v31  ;;  %v944_v30 = vld [vmem:[#allocation8] sm:$0xff] }
  0x87   :  { %907 = vmatprep.subr.bf16.mxu1 %v1390_v32 }
  0x89   :  { %867 = vmatpush1.bf16.msra.mxu0 %v1349_v33 }
  0x8a   :  { %868 = vmatprep.subr.bf16.mxu0 %v1354_v34  ;;  %908 = vmatpush1.bf16.msra.mxu1 %v1388_v35 }
  0x8b   :  { %909 = vmatprep.subr.bf16.mxu1 %v1396_v36 }
  0x8d   :  { %869 = vmatpush1.bf16.msra.mxu0 %v1352_v37 }
  0x8e   :  { %870 = vmatprep.subr.bf16.mxu0 %v1357_v38  ;;  %910 = vmatpush1.bf16.msra.mxu1 %v1394_v39 }
  0x8f   :  { %911 = vmatprep.subr.bf16.mxu1 %v1402_v40 }
  0x91   :  { %871 = vmatpush1.bf16.msra.mxu0 %v1355_v41 }
  0x92   :  { %872 = vmatprep.subr.bf16.mxu0 %v1363_v42  ;;  %912 = vmatpush1.bf16.msra.mxu1 %v1400_v43  ;;  %v204_v43 = vlaneseq }
  0x93   :  { %1195 = vmatprep.subr.mxu1 %v975_v63 }
  0x94   :  { %v205_v44 = vshrl.u32 %v204_v43, 7 }
  0x95   :  { %873 = vmatpush2.bf16.msra.mxu0 %v1361_v45  ;;  %930 = vmatmul.mubr.bf16.vlgmr.msra.gmra.mxu1 %v89_v47 }
  0x96   :  { %874 = vmatprep.subr.bf16.mxu0 %v1369_v46  ;;  %1196 = vmatpush3.msra.mxu1 %v959_v0  ;;  %v206_v45 = vsub.s32 0, %v205_v44  ;;  %v202_v46 = vld [vmem:[%s1585_s3] sm:$0x3]  ;;  %v210_v47 = vsub.s32 1, %v205_v44 }
  0x97   :  { %1197 = vmatprep.subr.mxu1 %v974_v1 }
  0x98   :  { %1198 = vmatpush3.msra.mxu1 %v958_v2 }
  0x99   :  { %875 = vmatpush2.bf16.msra.mxu0 %v1367_v48  ;;  %1199 = vmatprep.subr.mxu1 %v973_v3  ;;  %v207_v48 = vrot.slane %v202_v46, %v206_v45 }
  0x9a   :  { %876 = vmatprep.subr.bf16.mxu0 %v1375_v49  ;;  %1200 = vmatpush3.msra.mxu1 %v957_v4  ;;  %v211_v49 = vrot.slane %v202_v46, %v210_v47 }
  0x9b   :  { %1201 = vmatprep.subr.mxu1 %v972_v5  ;;  %v1194_v5 = vld [vmem:[%s1587_s5] ss:$0 sm:$0xff]  ;;  %s1490_s5 = scalar_lea.vmem %s1072_s19, 128 }
  0x9c   :  { %1202 = vmatpush3.msra.mxu1 %v956_v6  ;;  %p1491_p6 = scmp.ne.s32.totalorder %s1072_s19, %s1490_s5  ;;  %p1496_p8 = scmp.lt.s32.totalorder %s1490_s5, %s1490_s5 }
  0x9d   :  { %877 = vmatpush2.bf16.msra.mxu0 %v1373_v50  ;;  %1203 = vmatprep.subr.mxu1 %v971_v7 }
  0x9e   :  { %878 = vmatprep.subr.bf16.mxu0 %v1381_v51  ;;  %1204 = vmatpush3.msra.mxu1 %v955_v8  ;;  %p1497_p9 = por %p1496_p8, %p1495_p7 }
  0x9f   :  { %1205 = vmatprep.subr.mxu1 %v970_v9 }
  0xa0   :  { %1206 = vmatpush3.msra.mxu1 %v954_v10  ;;  %p1498_p10 = pnand %p1497_p9, %p1491_p6 }
  0xa1   :  { %879 = vmatpush2.bf16.msra.mxu0 %v1379_v52  ;;  %1207 = vmatprep.subr.mxu1 %v969_v11 }
  0xa2   :  { %880 = vmatprep.subr.bf16.mxu0 %v1387_v53  ;;  %1208 = vmatpush3.msra.mxu1 %v953_v12 }
  0xa3   :  { %1209 = vmatprep.subr.mxu1 %v968_v13 }
  0xa4   :  { %1210 = vmatpush3.msra.mxu1 %v952_v14 }
  0xa5   :  { %881 = vmatpush2.bf16.msra.mxu0 %v1385_v54  ;;  %1211 = vmatprep.subr.mxu1 %v967_v15 }
  0xa6   :  { %882 = vmatprep.subr.bf16.mxu0 %v1393_v55  ;;  %1212 = vmatpush3.msra.mxu1 %v951_v16 }
  0xa7   :  { %1213 = vmatprep.subr.mxu1 %v966_v17 }
  0xa8   :  { %1214 = vmatpush3.msra.mxu1 %v950_v18 }
  0xa9   :  { %883 = vmatpush2.bf16.msra.mxu0 %v1391_v56  ;;  %1215 = vmatprep.subr.mxu1 %v965_v19 }
  0xaa   :  { %884 = vmatprep.subr.bf16.mxu0 %v1399_v57  ;;  %1216 = vmatpush3.msra.mxu1 %v949_v20 }
  0xab   :  { %1217 = vmatprep.subr.mxu1 %v964_v21 }
  0xac   :  { %1218 = vmatpush3.msra.mxu1 %v948_v22 }
  0xad   :  { %885 = vmatpush2.bf16.msra.mxu0 %v1397_v58  ;;  %1219 = vmatprep.subr.mxu1 %v963_v23  ;;  %v938_v58 = vld [vmem:[#allocation5] sm:$0xff] }
  0xae   :  { %886 = vmatprep.subr.bf16.mxu0 %v1405_v59  ;;  %1220 = vmatpush3.msra.mxu1 %v947_v24 }
  0xaf   :  { %1221 = vmatprep.subr.mxu1 %v962_v25 }
  0xb0   :  { %1222 = vmatpush3.msra.mxu1 %v946_v26 }
  0xb1   :  { %887 = vmatpush2.bf16.msra.mxu0 %v1403_v60  ;;  %1223 = vmatprep.subr.mxu1 %v961_v27 }
  0xb2   :  { %1224 = vmatpush3.msra.mxu1 %v945_v28 }
  0xb3   :  { %1225 = vmatprep.subr.mxu1 %v960_v29 }
  0xb4   :  { %889 = vmatmul.mubr.bf16.vlgmr.msra.gmra.mxu0 %v87_v62  ;;  %1226 = vmatpush3.msra.mxu1 %v944_v30 }
 0x134   :  { %v808_v31 = vpop.f32.mrf.mxu0 }
 0x135   :  { %v849_v33 = vpop.f32.mrf.mxu1  ;;  %v809_v50 = vadd.f32 %v808_v31, %v207_v48 }
 0x136   :  { %v810_v32 = vpop.f32.mrf.mxu0 }
 0x137   :  { %v851_v35 = vpop.f32.mrf.mxu1  ;;  %v811_v51 = vadd.f32 %v810_v32, %v211_v49  ;;  %v850_v52 = vadd.f32 %v849_v33, %v809_v50 }
 0x138   :  { %v812_v34 = vpop.f32.mrf.mxu0 }
 0x139   :  { %v853_v37 = vpop.f32.mrf.mxu1  ;;  %v852_v54 = vadd.f32 %v851_v35, %v811_v51 }
 0x13a   :  { %v813_v36 = vpop.f32.mrf.mxu0 }
 0x13b   :  { %v854_v38 = vpop.f32.mrf.mxu1 }
 0x155   :  { %v931_v39 = vpop.f32.mrf.mxu1 }
 0x157   :  { %v933_v40 = vpop.f32.mrf.mxu1 }
 0x159   :  { %v935_v41 = vpop.f32.mrf.mxu1 }
 0x15b   :  { %v936_v42 = vpop.f32.mrf.mxu1 }
 0x174   :  { %v890_v53 = vpop.f32.mrf.mxu0 }
 0x175   :  { %v891_v55 = vadd.f32 %v890_v53, %v850_v52 }
 0x176   :  { %v892_v56 = vpop.f32.mrf.mxu0 }
 0x177   :  { %v932_v57 = vadd.f32 %v931_v39, %v891_v55  ;;  %v893_v59 = vadd.f32 %v892_v56, %v852_v54 }
 0x178   :  { %v894_v60 = vpop.f32.mrf.mxu0 }
 0x179   :  { %v934_v62 = vadd.f32 %v933_v40, %v893_v59  ;;  %v940_v63 = vmul.f32 %v938_v58, %v932_v57 }
 0x17a   :  { %v895_v0 = vpop.f32.mrf.mxu0 }
 0x17b   :  { %v941_v1 = vmul.f32 %v939_v61, %v934_v62  ;;  %v942_v3 = vmax.f32 %v940_v63, 0.0 }
 0x17d   :  { %v943_v2 = vmax.f32 %v941_v1, 0.0 }
 0x17f   :  { %1047 = vmatprep.mubr.f32.mxu1 %v943_v2 }
 0x180   :  { %1048 = vmatmul.mubr.f32.vlgmr.msra.gmra.mxu1 %v942_v3 }
 0x240   :  { %v1227_v4 = vpop.f32.mrf.mxu1 }
 0x242   :  { %v1228_v6 = vpop.f32.mrf.mxu1 }
 0x243   :  { %v1229_v7 = vadd.f32 %v1228_v6, %v1227_v4 }
 0x245   :  { %v1050_v8 = vadd.f32 %v1229_v7, %v1194_v5 }
 0x247   :  { %1053 = vmax.xlane.f32.xlu0 %v1050_v8 }
 0x2d0   :  { %v1054_v9 = vpop.xlane.xlu0 %1053 }
 0x2d1   :  { %v1055_v10 = vsub.f32 %v1050_v8, %v1054_v9 }
 0x2d3   :  { %v1056_v11 = vmul.f32 1.442695, %v1055_v10 }
 0x2d5   :  { %1406 = vpow2.f32 %v1056_v11 }
 0x2e2   :  { %v1407_v12 = vpop.eup %1406 }
 0x2e3   :  { %1058 = vadd.xlane.f32.xlu0 %v1407_v12 }
 0x36c   :  { %v1059_v13 = vpop.xlane.xlu0 %1058 }
 0x36d   :  { %1408 = vlog2.f32 %v1059_v13 }
 0x37a   :  { %v1409_v14 = vpop.eup %1408 }
 0x37b   :  { %v1061_v15 = vmul.f32 0.6931472, %v1409_v14 }
 0x37d   :  { %v1062_v16 = vadd.f32 %v1061_v15, %v1054_v9 }
 0x37f   :  { %v1063_v17 = vsub.f32 %v1050_v8, %v1062_v16 }
 0x381   :  { %1064 = vst [vmem:[#allocation10] sm:$0xff] %v1063_v17 }
 0x382   :  { %1501 = shalt.err (!%p1498_p10)
}
 0x383   :  { %1074 = dma.vmem_to_hbm [thread:$0]  %s1072_s19, 128, %s1588_s6, [#allocation4]  }
 0x384   :  { %1516 = dma.done.wait [#allocation4], 128  }
 0x385   :  { %1517 = vsyncadd [#allocation4], 4294967168 }
 0x386   :  { %1078 = vsyncpa [#allocation3], 1 }
 0x387   :  { %1079 = vsyncpa [#allocation6], 1 }
 0x388   :  { %1080 = vsyncpa [#allocation9], 1 }
 0x389   :  { %1081 = vsyncpa [#allocation4], 1 }

</bundles_post_ra>
